<compile_context>
chip_gen: v5e
topology: v5e:2x2
jax: 0.10.0
libtpu: 0.0.40
codegen_flags: <defaults>
</compile_context>

<pallas_src>
import jax
import jax.numpy as jnp
from jax.experimental import pallas as pl
from jax.experimental.pallas import tpu as pltpu

HEAD_PAD = 128  # pad fc3's single output column to a full lane width


def _round_up(x: int, m: int) -> int:
    return ((x + m - 1) // m) * m


def _critic_kernel(x_ref, w1_ref, b1_ref, w2_ref, b2_ref, w3p_ref, b3p_ref,
                   q_ref):
    # fc1 + ReLU: bf16 operands, f32 accumulation; bias/ReLU in f32 on the VPU.
    h1 = jnp.dot(x_ref[...], w1_ref[...], preferred_element_type=jnp.float32)
    h1 = jnp.maximum(h1 + b1_ref[...], 0.0)

    # fc2 + ReLU.
    h2 = jnp.dot(h1.astype(w2_ref.dtype), w2_ref[...],
                 preferred_element_type=jnp.float32)
    h2 = jnp.maximum(h2 + b2_ref[...], 0.0)

    # fc3 head on the MXU with the weight zero-padded to 128 output columns:
    # column 0 carries Q, the rest are zeros -> (tile_b, 128) lane-dense store.
    q = jnp.dot(h2.astype(w3p_ref.dtype), w3p_ref[...],
                preferred_element_type=jnp.float32)
    q_ref[...] = (q + b3p_ref[...]).astype(q_ref.dtype)


def prepare_params(params, compute_dtype=jnp.bfloat16):
    """One-time cast / pad of torch-layout params into kernel operands.

    Call once and reuse across training steps; avoids re-casting all weights
    (an extra HBM read/write) on every forward call.
    """
    H = params["w2"].shape[0]
    w3_col = jnp.reshape(params["w3"], (H,)).astype(compute_dtype)
    w3p = jnp.zeros((H, HEAD_PAD), compute_dtype).at[:, 0].set(w3_col)
    b3p = jnp.zeros((1, HEAD_PAD), jnp.float32).at[0, 0].set(
        jnp.reshape(params["b3"], ()).astype(jnp.float32))
    return {
        "w1": params["w1"].astype(compute_dtype),                    # (S+A, H)
        "b1": jnp.reshape(params["b1"], (1, H)).astype(jnp.float32),
        "w2": params["w2"].astype(compute_dtype),                    # (H, H)
        "b2": jnp.reshape(params["b2"], (1, H)).astype(jnp.float32),
        "w3p": w3p,                                                  # (H, 128)
        "b3p": b3p,                                                  # (1, 128)
    }


def _choose_batch_tile(B, in_dim, H, block_b, itemsize, min_grid_steps):
    """Even-split batch tiling with a VMEM guardrail.

    Splitting round_up(B, 8) evenly across the minimum number of grid steps
    avoids near-dead pad tiles (e.g. B=520 with a 512 tile).  The cap keeps
    f32 h1/h2 temporaries + double-buffered x/out blocks under ~24 MiB so the
    kernel also fits v7x's 32 MiB scoped / 64 MiB physical VMEM at larger H.
    """
    b8 = _round_up(max(B, 1), 8)
    per_row_bytes = 2 * H * 4 + 2 * HEAD_PAD * 4 + 2 * in_dim * itemsize
    vmem_budget = 24 << 20
    cap = max(8, (vmem_budget // per_row_bytes) // 8 * 8)
    block_b = max(8, min(block_b, cap))
    num_tiles = max(-(-b8 // block_b), min_grid_steps)
    num_tiles = max(1, min(num_tiles, b8 // 8))
    tile_b = _round_up(-(-b8 // num_tiles), 8)
    return tile_b, tile_b * num_tiles, num_tiles


def continuous_critic_forward(state, action, prepared, *,
                              block_b: int = 2048,
                              min_grid_steps: int = 1,
                              compute_dtype=jnp.bfloat16):
    """Q(s, a) forward. state: (B, S), action: (B, A) -> (B, 1) float32."""
    B = state.shape[0]
    in_dim = state.shape[1] + action.shape[1]
    H = prepared["w2"].shape[0]
    itm = jnp.dtype(compute_dtype).itemsize

    # fc1 concat done XLA-side: for small S+A this costs only B*(S+A)*itm bytes
    # of HBM and saves a whole MXU pass + one input DMA stream per grid step.
    x = jnp.concatenate([state, action], axis=-1).astype(compute_dtype)

    tile_b, b_pad, num_tiles = _choose_batch_tile(
        B, in_dim, H, block_b, itm, min_grid_steps)
    if b_pad != B:
        x = jnp.pad(x, ((0, b_pad - B), (0, 0)))

    # Advisory cost estimate for XLA's scheduler.
    flops = 2 * b_pad * (in_dim * H + H * H + H * HEAD_PAD)
    bytes_accessed = (
        b_pad * in_dim * itm                                  # input
        + (in_dim * H + H * H + H * HEAD_PAD) * itm           # weights
        + (2 * H + HEAD_PAD) * 4                              # biases (f32)
        + b_pad * HEAD_PAD * 4)                               # padded output

    # VMEM: double-buffered x/out blocks + resident weights + f32 temporaries.
    est_vmem = (
        2 * tile_b * in_dim * itm
        + 2 * (in_dim * H + H * H + H * HEAD_PAD) * itm
        + 2 * (2 * H + HEAD_PAD) * 4
        + 2 * tile_b * HEAD_PAD * 4
        + 2 * tile_b * H * 4)
    vmem_limit = int(min(max(2 * est_vmem, 32 << 20), 64 << 20))

    q_pad = pl.pallas_call(
        _critic_kernel,
        out_shape=jax.ShapeDtypeStruct((b_pad, HEAD_PAD), jnp.float32),
        grid=(num_tiles,),
        in_specs=[
            pl.BlockSpec((tile_b, in_dim), lambda i: (i, 0)),   # [s|a] tile
            pl.BlockSpec((in_dim, H), lambda i: (0, 0)),        # w1 (resident)
            pl.BlockSpec((1, H), lambda i: (0, 0)),             # b1
            pl.BlockSpec((H, H), lambda i: (0, 0)),             # w2 (resident)
            pl.BlockSpec((1, H), lambda i: (0, 0)),             # b2
            pl.BlockSpec((H, HEAD_PAD), lambda i: (0, 0)),      # w3 padded
            pl.BlockSpec((1, HEAD_PAD), lambda i: (0, 0)),      # b3 padded row
        ],
        out_specs=pl.BlockSpec((tile_b, HEAD_PAD), lambda i: (i, 0)),
        compiler_params=pltpu.CompilerParams(
            dimension_semantics=("parallel",),                  # megacore-safe
            vmem_limit_bytes=vmem_limit),
        cost_estimate=pl.CostEstimate(
            flops=flops, transcendentals=0, bytes_accessed=bytes_accessed),
    )(x, prepared["w1"], prepared["b1"], prepared["w2"], prepared["b2"],
      prepared["w3p"], prepared["b3p"])

    # Column 0 of the lane-padded output carries Q; drop batch padding.
    return q_pad[:B, :1]


def init_params(key, state_dim, action_dim, hidden_dim=256, dtype=jnp.float32):
    """nn.Linear-style uniform fan-in init; weights stored as (in, out)."""
    ks = jax.random.split(key, 6)

    def uniform(k, shape, fan_in):
        bound = 1.0 / (float(fan_in) ** 0.5)
        return jax.random.uniform(k, shape, dtype, -bound, bound)

    in_dim = state_dim + action_dim
    return {
        "w1": uniform(ks[0], (in_dim, hidden_dim), in_dim),
        "b1": uniform(ks[1], (hidden_dim,), in_dim),
        "w2": uniform(ks[2], (hidden_dim, hidden_dim), hidden_dim),
        "b2": uniform(ks[3], (hidden_dim,), hidden_dim),
        "w3": uniform(ks[4], (hidden_dim, 1), hidden_dim),
        "b3": uniform(ks[5], (1,), hidden_dim),
    }


def _reference(state, action, params, compute_dtype=jnp.bfloat16):
    """Plain-JAX reference mirroring the kernel's bf16-operand / f32-accum math."""
    x = jnp.concatenate([state, action], axis=-1).astype(compute_dtype)
    h1 = jnp.dot(x, params["w1"].astype(compute_dtype),
                 preferred_element_type=jnp.float32)
    h1 = jnp.maximum(h1 + params["b1"].astype(jnp.float32), 0.0)
    h2 = jnp.dot(h1.astype(compute_dtype), params["w2"].astype(compute_dtype),
                 preferred_element_type=jnp.float32)
    h2 = jnp.maximum(h2 + params["b2"].astype(jnp.float32), 0.0)
    q = jnp.dot(h2.astype(compute_dtype), params["w3"].astype(compute_dtype),
                preferred_element_type=jnp.float32)
    return q + params["b3"].astype(jnp.float32)


if __name__ == "__main__":
    key = jax.random.PRNGKey(0)
    k_state, k_action, k_params = jax.random.split(key, 3)

    batch, state_dim, action_dim, hidden_dim = 2, 8, 4, 32
    state = jax.random.normal(k_state, (batch, state_dim), jnp.float32)
    action = jax.random.normal(k_action, (batch, action_dim), jnp.float32)

    params = init_params(k_params, state_dim, action_dim, hidden_dim)
    prepared = prepare_params(params)          # one-time cast / pad

    q = continuous_critic_forward(state, action, prepared)
    jax.block_until_ready(q)

    q_ref = _reference(state, action, params)
    assert q.shape == (batch, 1), q.shape
    assert jnp.allclose(q, q_ref, atol=1e-2, rtol=1e-2), (q, q_ref)

    print("KERNEL_OK")
</pallas_src>

<mosaic_0001>
module attributes {stable_mosaic.version = 11 : i64} {
  func.func @_critic_kernel(%arg0: i32, %arg1: memref<8x12xbf16, #tpu.memory_space<vmem>>, %arg2: memref<12x32xbf16, #tpu.memory_space<vmem>>, %arg3: memref<1x32xf32, #tpu.memory_space<vmem>>, %arg4: memref<32x32xbf16, #tpu.memory_space<vmem>>, %arg5: memref<1x32xf32, #tpu.memory_space<vmem>>, %arg6: memref<32x128xbf16, #tpu.memory_space<vmem>>, %arg7: memref<1x128xf32, #tpu.memory_space<vmem>>, %arg8: memref<8x128xf32, #tpu.memory_space<vmem>>) attributes {dimension_semantics = [#tpu.dimension_semantics<parallel>], iteration_bounds = array<i64: 1>, scalar_prefetch = 0 : i64, scratch_operands = 0 : i64, tpu.core_type = #tpu.core_type<tc>, window_params = [{transform_indices = @transform_0, window_bounds = array<i64: 8, 12>}, {pipeline_mode = #tpu.pipeline_mode<synchronous>, transform_indices = @transform_1, window_bounds = array<i64: 12, 32>}, {pipeline_mode = #tpu.pipeline_mode<synchronous>, transform_indices = @transform_2, window_bounds = array<i64: 1, 32>}, {pipeline_mode = #tpu.pipeline_mode<synchronous>, transform_indices = @transform_3, window_bounds = array<i64: 32, 32>}, {pipeline_mode = #tpu.pipeline_mode<synchronous>, transform_indices = @transform_4, window_bounds = array<i64: 1, 32>}, {pipeline_mode = #tpu.pipeline_mode<synchronous>, transform_indices = @transform_5, window_bounds = array<i64: 32, 128>}, {pipeline_mode = #tpu.pipeline_mode<synchronous>, transform_indices = @transform_6, window_bounds = array<i64: 1, 128>}, {transform_indices = @transform_7, window_bounds = array<i64: 8, 128>}]} {
    %c0 = arith.constant 0 : index
    %c0_0 = arith.constant 0 : index
    %0 = vector.load %arg1[%c0, %c0_0] : memref<8x12xbf16, #tpu.memory_space<vmem>>, vector<8x12xbf16>
    %c0_1 = arith.constant 0 : index
    %c0_2 = arith.constant 0 : index
    %1 = vector.load %arg2[%c0_1, %c0_2] : memref<12x32xbf16, #tpu.memory_space<vmem>>, vector<12x32xbf16>
    %cst = arith.constant dense<0.000000e+00> : vector<8x32xf32>
    %2 = tpu.matmul %0, %1, %cst {dimension_numbers = #tpu.dot_dimension_numbers<[1], [0], [0], [1], [0, 0, 1, 1], [], []>} : vector<8x12xbf16>, vector<12x32xbf16>, vector<8x32xf32> -> vector<8x32xf32>
    %c0_3 = arith.constant 0 : index
    %c0_4 = arith.constant 0 : index
    %3 = vector.load %arg3[%c0_3, %c0_4] : memref<1x32xf32, #tpu.memory_space<vmem>>, vector<1x32xf32>
    %4 = vector.broadcast %3 : vector<1x32xf32> to vector<8x32xf32>
    %5 = arith.addf %2, %4 : vector<8x32xf32>
    %cst_5 = arith.constant 0.000000e+00 : f32
    %6 = vector.broadcast %cst_5 : f32 to vector<8x32xf32>
    %7 = arith.maximumf %5, %6 : vector<8x32xf32>
    %8 = arith.truncf %7 : vector<8x32xf32> to vector<8x32xbf16>
    %c0_6 = arith.constant 0 : index
    %c0_7 = arith.constant 0 : index
    %9 = vector.load %arg4[%c0_6, %c0_7] : memref<32x32xbf16, #tpu.memory_space<vmem>>, vector<32x32xbf16>
    %cst_8 = arith.constant dense<0.000000e+00> : vector<8x32xf32>
    %10 = tpu.matmul %8, %9, %cst_8 {dimension_numbers = #tpu.dot_dimension_numbers<[1], [0], [0], [1], [0, 0, 1, 1], [], []>} : vector<8x32xbf16>, vector<32x32xbf16>, vector<8x32xf32> -> vector<8x32xf32>
    %c0_9 = arith.constant 0 : index
    %c0_10 = arith.constant 0 : index
    %11 = vector.load %arg5[%c0_9, %c0_10] : memref<1x32xf32, #tpu.memory_space<vmem>>, vector<1x32xf32>
    %12 = vector.broadcast %11 : vector<1x32xf32> to vector<8x32xf32>
    %13 = arith.addf %10, %12 : vector<8x32xf32>
    %cst_11 = arith.constant 0.000000e+00 : f32
    %14 = vector.broadcast %cst_11 : f32 to vector<8x32xf32>
    %15 = arith.maximumf %13, %14 : vector<8x32xf32>
    %16 = arith.truncf %15 : vector<8x32xf32> to vector<8x32xbf16>
    %c0_12 = arith.constant 0 : index
    %c0_13 = arith.constant 0 : index
    %17 = vector.load %arg6[%c0_12, %c0_13] : memref<32x128xbf16, #tpu.memory_space<vmem>>, vector<32x128xbf16>
    %cst_14 = arith.constant dense<0.000000e+00> : vector<8x128xf32>
    %18 = tpu.matmul %16, %17, %cst_14 {dimension_numbers = #tpu.dot_dimension_numbers<[1], [0], [0], [1], [0, 0, 1, 1], [], []>} : vector<8x32xbf16>, vector<32x128xbf16>, vector<8x128xf32> -> vector<8x128xf32>
    %c0_15 = arith.constant 0 : index
    %c0_16 = arith.constant 0 : index
    %19 = vector.load %arg7[%c0_15, %c0_16] : memref<1x128xf32, #tpu.memory_space<vmem>>, vector<1x128xf32>
    %20 = vector.broadcast %19 : vector<1x128xf32> to vector<8x128xf32>
    %21 = arith.addf %18, %20 : vector<8x128xf32>
    %c0_17 = arith.constant 0 : index
    %c0_18 = arith.constant 0 : index
    %22 = vector.load %arg8[%c0_17, %c0_18] : memref<8x128xf32, #tpu.memory_space<vmem>>, vector<8x128xf32>
    tpu.vector_store %arg8[%c0_17, %c0_18], %21 {strides = array<i32>} : memref<8x128xf32, #tpu.memory_space<vmem>>, vector<8x128xf32>,
    return
  }
  func.func @transform_0(%arg0: i32) -> (i32, i32) {
    %c0_i32 = arith.constant 0 : i32
    %c0_i32_0 = arith.constant 0 : i32
    return %arg0, %c0_i32 : i32, i32
  }
  func.func @transform_1(%arg0: i32) -> (i32, i32) {
    %c0_i32 = arith.constant 0 : i32
    %c0_i32_0 = arith.constant 0 : i32
    %c0_i32_1 = arith.constant 0 : i32
    return %c0_i32, %c0_i32_0 : i32, i32
  }
  func.func @transform_2(%arg0: i32) -> (i32, i32) {
    %c0_i32 = arith.constant 0 : i32
    %c0_i32_0 = arith.constant 0 : i32
    %c0_i32_1 = arith.constant 0 : i32
    return %c0_i32, %c0_i32_0 : i32, i32
  }
  func.func @transform_3(%arg0: i32) -> (i32, i32) {
    %c0_i32 = arith.constant 0 : i32
    %c0_i32_0 = arith.constant 0 : i32
    %c0_i32_1 = arith.constant 0 : i32
    return %c0_i32, %c0_i32_0 : i32, i32
  }
  func.func @transform_4(%arg0: i32) -> (i32, i32) {
    %c0_i32 = arith.constant 0 : i32
    %c0_i32_0 = arith.constant 0 : i32
    %c0_i32_1 = arith.constant 0 : i32
    return %c0_i32, %c0_i32_0 : i32, i32
  }
  func.func @transform_5(%arg0: i32) -> (i32, i32) {
    %c0_i32 = arith.constant 0 : i32
    %c0_i32_0 = arith.constant 0 : i32
    %c0_i32_1 = arith.constant 0 : i32
    return %c0_i32, %c0_i32_0 : i32, i32
  }
  func.func @transform_6(%arg0: i32) -> (i32, i32) {
    %c0_i32 = arith.constant 0 : i32
    %c0_i32_0 = arith.constant 0 : i32
    %c0_i32_1 = arith.constant 0 : i32
    return %c0_i32, %c0_i32_0 : i32, i32
  }
  func.func @transform_7(%arg0: i32) -> (i32, i32) {
    %c0_i32 = arith.constant 0 : i32
    %c0_i32_0 = arith.constant 0 : i32
    return %arg0, %c0_i32 : i32, i32
  }
}

</mosaic_0001>

<bundles_post_ra>
// kernel: tpu_custom_call.1
= control target key start
LH: loop header
LB: loop body
LE: loop exit
PB: predicated region body
PF: predicated region fallthrough
CT: control target
= control target key end

     0   :  { %12 = vsyncpa [#allocation3], 0  ;;  %s456_s0 = inlined_call_operand.hbm [shape: bf16[8,12], index: 0, kind: input, shape index: {}]   ;;  %s457_s1 = inlined_call_operand.hbm [shape: bf16[12,32], index: 1, kind: input, shape index: {}]   ;;  %s458_s2 = inlined_call_operand.vmem [shape: f32[1,32], index: 2, kind: input, shape index: {}]   ;;  %s459_s3 = inlined_call_operand.hbm [shape: bf16[32,32], index: 3, kind: input, shape index: {}]   ;;  %s460_s4 = inlined_call_operand.vmem [shape: f32[1,32], index: 4, kind: input, shape index: {}]   ;;  %s461_s5 = inlined_call_operand.hbm [shape: bf16[32,128], index: 5, kind: input, shape index: {}]   ;;  %s462_s6 = inlined_call_operand.vmem [shape: f32[1,128], index: 6, kind: input, shape index: {}]   ;;  %s463_s7 = inlined_call_operand.hbm [shape: f32[8,128], index: 7, kind: output, shape index: {}]  }
   0x1   :  { %13 = vsyncpa [#allocation6], 0 }
   0x2   :  { %14 = vsyncpa [#allocation9], 0  ;;  %s31_s26 = sshll.u32 %s457_s1, 4  ;;  %s32_s26 = int_to_ptr.hbm [resolvable:$true] %s31_s26 }
   0x3   :  { %15 = vsyncpa [#allocation4], 0  ;;  %s385_s27 = smov [#allocation5]   ;;  %s21_s8 = sshll.u32 %s456_s0, 4  ;;  %s22_s8 = int_to_ptr.hbm [resolvable:$true] %s21_s8 }
   0x4   :  { %s33_s28 = sshll.u32 %s385_s27, 4  ;;  %s386_s9 = smov 64   ;;  %s34_s28 = int_to_ptr.vmem [resolvable:$true] %s33_s28 }
   0x5   :  { %s387_s10 = smov 4   ;;  %s388_s11 = smov [#allocation2]  }
   0x6   :  { %39 = dma.hbm_to_vmem [thread:$0]  %s32_s26, 128, %s34_s28, [#allocation6], %s386_s9, %s386_s9, %s387_s10  }
   0x7   :  { %s23_s12 = sshll.u32 %s388_s11, 4  ;;  %s46_s15 = sshll.u32 %s459_s3, 4  ;;  %s24_s12 = int_to_ptr.vmem [resolvable:$true] %s23_s12  ;;  %s47_s15 = int_to_ptr.hbm [resolvable:$true] %s46_s15 }
   0x8   :  { %26 = dma.hbm_to_vmem [thread:$0]  %s22_s8, 64, %s24_s12, [#allocation3]  }
   0x9   :  { %s61_s17 = sshll.u32 %s461_s5, 4  ;;  %s389_s18 = smov [#allocation7]   ;;  %s62_s17 = int_to_ptr.hbm [resolvable:$true] %s61_s17 }
   0xa   :  { %s48_s19 = sshll.u32 %s389_s18, 4  ;;  %s390_s0 = smov [#allocation8]   ;;  %s49_s19 = int_to_ptr.vmem [resolvable:$true] %s48_s19 }
   0xb   :  { %54 = dma.hbm_to_vmem [thread:$0]  %s47_s15, 256, %s49_s19, [#allocation6], %s386_s9, %s386_s9, %s387_s10  }
   0xc   :  { %s63_s20 = sshll.u32 %s390_s0, 4  ;;  %s64_s20 = int_to_ptr.vmem [resolvable:$true] %s63_s20 }
   0xd   :  { %69 = dma.hbm_to_vmem [thread:$0]  %s62_s17, 256, %s64_s20, [#allocation9], %s386_s9, %s386_s9, %s387_s10  }
   0xe   :  { %377 = dma.done.wait [#allocation3], 64  }
   0xf   :  { %378 = vsyncadd [#allocation3], 4294967232 }
  0x10   :  { %379 = dma.done.wait [#allocation6], 384  }
  0x11   :  { %380 = vsyncadd [#allocation6], 4294966912 }
  0x12   :  { %381 = dma.done.wait [#allocation9], 256  }
  0x13   :  { %382 = vsyncadd [#allocation9], 4294967040  ;;  %v221_v0 = vld [vmem:[#allocation5] sm:$0xf]  ;;  %v242_v1 = vld [vmem:[#allocation5] sm:$0x30] }
  0x14   :  { %vm105_vm0 = vcmask 1045504   ;;  %v222_v2 = vor.u32 %v242_v1, %v221_v0  ;;  %v89_v4 = vld [vmem:[#allocation2] sm:$0xf]  ;;  %vm101_vm1 = vcmask 97280   ;;  %v244_v5 = vld [vmem:[#allocation7 + $0x8] sm:$0xff]  ;;  %v243_v6 = vld [vmem:[#allocation7] sm:$0xff] }
  0x15   :  { %154 = vmatpush.bf16.msra.mxu1 %v244_v5  ;;  %v254_v7 = vld [vmem:[%s458_s2] ss:$0 sm:$0xff]  ;;  %vm144_vm2 = vcmask 261120   ;;  %v246_v13 = vld [vmem:[#allocation8 + $0x8] sm:$0xff]  ;;  %s391_s24 = smov [#allocation10]   ;;  %s207_s28 = sshll.u32 %s463_s7, 4  ;;  %s208_s28 = int_to_ptr.hbm [resolvable:$true] %s207_s28 }
  0x16   :  { %v107_v3 = vsel %vm105_vm0, %v222_v2, 0  ;;  %192 = vmatpush.bf16.msra.mxu2 %v246_v13  ;;  %v245_v14 = vld [vmem:[#allocation8] sm:$0xff]  ;;  %s205_s25 = sshll.u32 %s391_s24, 4  ;;  %s206_s25 = int_to_ptr.vmem [resolvable:$true] %s205_s25 }
  0x17   :  { %116 = vmatpush.bf16.msra.mxu0 %v107_v3  ;;  %v255_v15 = vld [vmem:[%s460_s4] ss:$0 sm:$0xff] }
  0x18   :  { %v256_v21 = vld [vmem:[%s462_s6] ss:$0 sm:$0xff] }
  0x19   :  { %155 = vmatpush.bf16.msra.mxu1 %v243_v6 }
  0x1a   :  { %223 = vmatmul.msk.bf16.vlgmr.msra.gmra.mxu0 %vm101_vm1, %v89_v4  ;;  %193 = vmatpush.bf16.msra.mxu2 %v245_v14 }
  0x97   :  { %v118_v8 = vpop.f32.mrf.mxu0 }
  0x98   :  { %v119_v9 = vadd.f32 %v254_v7, %v118_v8 }
  0x9a   :  { %v122_v10 = vmax.f32 %v119_v9, 0.0 }
  0x9c   :  { %v123_v11 = vpack.c.bf16 %v122_v10, %v122_v10 }
  0x9e   :  { %232 = vmatmul.msk.bf16.vlgmr.msra.gmra.mxu1 %vm144_vm2, %v123_v11 }
  0x9f   :  { %v120_v12 = vpop.f32.mrf.mxu0 }
 0x11b   :  { %v157_v16 = vpop.f32.mrf.mxu1 }
 0x11c   :  { %v158_v17 = vadd.f32 %v255_v15, %v157_v16 }
 0x11e   :  { %v161_v18 = vmax.f32 %v158_v17, 0.0 }
 0x120   :  { %v162_v19 = vpack.c.bf16 %v161_v18, %v161_v18 }
 0x122   :  { %241 = vmatmul.msk.bf16.vlgmr.msra.gmra.mxu2 %vm144_vm2, %v162_v19 }
 0x123   :  { %v159_v20 = vpop.f32.mrf.mxu1 }
 0x1a5   :  { %v195_v22 = vpop.f32.mrf.mxu2 }
 0x1a6   :  { %v196_v23 = vadd.f32 %v256_v21, %v195_v22 }
 0x1a8   :  { %199 = vst [vmem:[#allocation10] sm:$0xff] %v196_v23 }
 0x1a9   :  { %210 = dma.vmem_to_hbm [thread:$0]  %s206_s25, 128, %s208_s28, [#allocation4]  }
 0x1ad   :  { %v197_v24 = vpop.f32.mrf.mxu2 }
 0x1ae   :  { %383 = dma.done.wait [#allocation4], 128  }
 0x1af   :  { %384 = vsyncadd [#allocation4], 4294967168 }
 0x1b0   :  { %215 = vsyncpa [#allocation3], 1 }
 0x1b1   :  { %216 = vsyncpa [#allocation6], 1 }
 0x1b2   :  { %217 = vsyncpa [#allocation9], 1 }
 0x1b3   :  { %218 = vsyncpa [#allocation4], 1 }

</bundles_post_ra>
